<compile_context>
chip_gen: v7x
topology: tpu7x:2x2x1
jax: 0.10.0
libtpu: 0.0.40
codegen_flags: <defaults>
</compile_context>

<pallas_src>
import functools

import jax
import jax.numpy as jnp
from jax.experimental import pallas as pl
from jax.experimental.pallas import tpu as pltpu  # noqa: F401  (TPU backend)

BN_EPS = 1e-5
LN_EPS = 1e-5


def _pad128(n):
    return ((int(n) + 127) // 128) * 128


def fc_actor_kernel(x_ref, w1_ref, w2_ref, w3_ref, v_ref, o_ref, *, h1, h2):
    # x_ref: (B, S) f32 raw state.  BatchNorm needs full-batch statistics, so
    # this is a single grid-less program on one TensorCore.
    x = x_ref[...]

    # ---- BatchNorm1d, training mode (biased batch stats, gamma=1, beta=0) ----
    mu = jnp.mean(x, axis=0, keepdims=True)
    xc = x - mu
    var = jnp.mean(xc * xc, axis=0, keepdims=True)
    x = xc * jax.lax.rsqrt(var + BN_EPS)

    v = v_ref[...]  # (8, Dv) f32, rows = [b1, g1, be1, b2, g2, be2, b3, 0]

    def linear_ln_relu(h, w_ref_i, b, gamma, beta):
        # MXU operands in the weight dtype (bf16 by default), f32 accumulate.
        y = jnp.dot(h.astype(w_ref_i.dtype), w_ref_i[...],
                    preferred_element_type=jnp.float32) + b
        # Activations are exactly h1/h2 lanes wide (no padded lanes), so a
        # plain two-pass LayerNorm is exact -- no one-pass cancellation risk.
        mean = jnp.mean(y, axis=-1, keepdims=True)
        yc = y - mean
        lvar = jnp.mean(yc * yc, axis=-1, keepdims=True)
        yn = yc * jax.lax.rsqrt(lvar + LN_EPS) * gamma + beta
        return jnp.maximum(yn, 0.0)

    h = linear_ln_relu(x, w1_ref, v[0:1, :h1], v[1:2, :h1], v[2:3, :h1])
    h = linear_ln_relu(h, w2_ref, v[3:4, :h2], v[4:5, :h2], v[5:6, :h2])

    # ---- fc3 -> tanh.  Output lanes >= action_size are tanh(0 + 0) = 0 (zero
    # weight cols / zero bias there); the wrapper slices them off.  Output
    # itself stays 128-lane dense for unmasked stores.
    a_pad = o_ref.shape[-1]
    y3 = jnp.dot(h.astype(w3_ref.dtype), w3_ref[...],
                 preferred_element_type=jnp.float32) + v[6:7, :a_pad]
    o_ref[...] = jnp.tanh(y3).astype(o_ref.dtype)


@functools.partial(jax.jit, static_argnames=("h1", "h2", "action_size"))
def _fc_actor_jit(state, w1, w2, w3, vec_slab, *, h1, h2, action_size):
    B, S = state.shape
    A_pad = w3.shape[-1]
    x = state.astype(jnp.float32)

    flops = 2 * B * (S * h1 + h1 * h2 + h2 * A_pad)
    transcendentals = B * (A_pad + 2) + S  # tanh + LN rsqrt + BN rsqrt (advisory)
    bytes_accessed = (x.size * 4
                      + w1.size * w1.dtype.itemsize
                      + w2.size * w2.dtype.itemsize
                      + w3.size * w3.dtype.itemsize
                      + vec_slab.size * 4
                      + B * A_pad * 4)

    kernel = functools.partial(fc_actor_kernel, h1=h1, h2=h2)
    out_pad = pl.pallas_call(
        kernel,
        out_shape=jax.ShapeDtypeStruct((B, A_pad), jnp.float32),
        in_specs=[
            pl.BlockSpec((B, S), lambda: (0, 0)),          # raw state (full block)
            pl.BlockSpec(w1.shape, lambda: (0, 0)),        # (S, h1)
            pl.BlockSpec(w2.shape, lambda: (0, 0)),        # (h1, h2)
            pl.BlockSpec(w3.shape, lambda: (0, 0)),        # (h2, A_pad=128)
            pl.BlockSpec(vec_slab.shape, lambda: (0, 0)),  # (8, Dv) biases / LN params
        ],
        out_specs=pl.BlockSpec((B, A_pad), lambda: (0, 0)),  # lane-dense output
        cost_estimate=pl.CostEstimate(flops=flops,
                                      transcendentals=transcendentals,
                                      bytes_accessed=bytes_accessed),
    )(x, w1, w2, w3, vec_slab)

    return out_pad[:, :action_size]


def fc_actor_forward(state, params):
    """state: (B, state_size) float32 -> (B, action_size) float32."""
    m = params["meta"]
    return _fc_actor_jit(state, params["w1"], params["w2"], params["w3"],
                         params["vec_slab"], h1=m["h1"], h2=m["h2"],
                         action_size=m["action_size"])


def init_params(key, state_size, action_size, fc_units=(32, 32),
                mxu_dtype=jnp.bfloat16):
    """Synthetic init mirroring FCActor.reset_parameters.

    Weights are stored transposed as (in, out) so the kernel computes
    y = x @ W + b.  PyTorch's hidden_init uses weight.size()[0]
    (= out_features) as the "fan_in" quirk; biases keep nn.Linear's default
    U(-1/sqrt(in_features), 1/sqrt(in_features)).  mxu_dtype=jnp.bfloat16
    (default) is the native MXU operand dtype on v5e/v6e/v7x; pass
    jnp.float32 for bit-parity with a pure-f32 reference.
    """
    h1, h2 = fc_units
    A_pad = _pad128(action_size)       # lane-dense output width
    Dv = max(h1, h2, A_pad)            # packed bias/LN-param slab width
    ks = jax.random.split(key, 6)

    def uni(k, shape, lim):
        return jax.random.uniform(k, shape, jnp.float32, -lim, lim)

    w1 = uni(ks[0], (state_size, h1), 1.0 / h1 ** 0.5)   # hidden_init quirk
    b1 = uni(ks[1], (h1,), 1.0 / state_size ** 0.5)
    w2 = uni(ks[2], (h1, h2), 1.0 / h2 ** 0.5)
    b2 = uni(ks[3], (h2,), 1.0 / h1 ** 0.5)
    w3 = uni(ks[4], (h2, action_size), 0.003)
    b3 = uni(ks[5], (action_size,), 1.0 / h2 ** 0.5)

    def pad_to(vec, n):
        return jnp.pad(vec, (0, n - vec.shape[0]))

    vec_slab = jnp.stack([
        pad_to(b1, Dv),
        pad_to(jnp.ones((h1,), jnp.float32), Dv),    # ln1 gamma
        pad_to(jnp.zeros((h1,), jnp.float32), Dv),   # ln1 beta
        pad_to(b2, Dv),
        pad_to(jnp.ones((h2,), jnp.float32), Dv),    # ln2 gamma
        pad_to(jnp.zeros((h2,), jnp.float32), Dv),   # ln2 beta
        pad_to(b3, Dv),
        jnp.zeros((Dv,), jnp.float32),               # unused row -> 8 sublanes
    ])

    return {
        "w1": w1.astype(mxu_dtype),
        "w2": w2.astype(mxu_dtype),
        "w3": jnp.pad(w3, ((0, 0), (0, A_pad - action_size))).astype(mxu_dtype),
        "vec_slab": vec_slab,
        "meta": {"state_size": state_size, "h1": h1, "h2": h2,
                 "action_size": action_size, "A_pad": A_pad},
    }


def _reference_forward(state, params):
    """Pure-JAX reference mirroring the kernel math (same MXU operand dtype)."""
    m = params["meta"]
    h1, h2, A = m["h1"], m["h2"], m["action_size"]
    mxu_dtype = params["w1"].dtype
    w1, w2 = params["w1"], params["w2"]
    w3 = params["w3"][:, :A]
    v = params["vec_slab"]
    b1, g1, be1 = v[0, :h1], v[1, :h1], v[2, :h1]
    b2, g2, be2 = v[3, :h2], v[4, :h2], v[5, :h2]
    b3 = v[6, :A]

    x = state.astype(jnp.float32)
    mu = x.mean(0, keepdims=True)
    var = ((x - mu) ** 2).mean(0, keepdims=True)
    x = (x - mu) / jnp.sqrt(var + BN_EPS)

    def dot(a, w):
        return jnp.dot(a.astype(mxu_dtype), w, preferred_element_type=jnp.float32)

    def ln(y, g, b):
        mu = y.mean(-1, keepdims=True)
        var = ((y - mu) ** 2).mean(-1, keepdims=True)
        return (y - mu) / jnp.sqrt(var + LN_EPS) * g + b

    y = jax.nn.relu(ln(dot(x, w1) + b1, g1, be1))
    y = jax.nn.relu(ln(dot(y, w2) + b2, g2, be2))
    return jnp.tanh(dot(y, w3) + b3)


if __name__ == "__main__":
    key = jax.random.PRNGKey(0)
    k_state, k_params = jax.random.split(key)

    B, state_size, action_size = 8, 16, 4
    fc_units = (32, 32)

    state = jax.random.normal(k_state, (B, state_size), jnp.float32)

    # Default path: bf16 MXU operands, f32 VPU/EUP math.
    params = init_params(k_params, state_size, action_size, fc_units)
    out = jax.block_until_ready(fc_actor_forward(state, params))
    assert out.shape == (B, action_size)
    assert bool(jnp.all(jnp.isfinite(out)))
    assert bool(jnp.all(jnp.abs(out) <= 1.0))
    ref = _reference_forward(state, params)
    assert bool(jnp.allclose(out, ref, atol=5e-3, rtol=5e-3))

    # Bit-parity mode: f32 weights, tight tolerance against the f32 reference.
    params32 = init_params(k_params, state_size, action_size, fc_units,
                           mxu_dtype=jnp.float32)
    out32 = jax.block_until_ready(fc_actor_forward(state, params32))
    ref32 = _reference_forward(state, params32)
    assert bool(jnp.allclose(out32, ref32, atol=1e-4, rtol=1e-4))

    print("KERNEL_OK")
</pallas_src>

<mosaic_0001>
module attributes {stable_mosaic.version = 11 : i64} {
  func.func @fc_actor_kernel(%arg0: memref<8x16xf32, #tpu.memory_space<vmem>>, %arg1: memref<16x32xbf16, #tpu.memory_space<vmem>>, %arg2: memref<32x32xbf16, #tpu.memory_space<vmem>>, %arg3: memref<32x128xbf16, #tpu.memory_space<vmem>>, %arg4: memref<8x128xf32, #tpu.memory_space<vmem>>, %arg5: memref<8x128xf32, #tpu.memory_space<vmem>>) attributes {dimension_semantics = [], scalar_prefetch = 0 : i64, scratch_operands = 0 : i64, tpu.core_type = #tpu.core_type<tc>} {
    %c0 = arith.constant 0 : index
    %c0_0 = arith.constant 0 : index
    %0 = vector.load %arg0[%c0, %c0_0] : memref<8x16xf32, #tpu.memory_space<vmem>>, vector<8x16xf32>
    %cst = arith.constant dense<0.000000e+00> : vector<16xf32>
    %1 = vector.multi_reduction <add>, %0, %cst [0] : vector<8x16xf32> to vector<16xf32>
    %2 = vector.shape_cast %1 : vector<16xf32> to vector<1x16xf32>
    %cst_1 = arith.constant 8.000000e+00 : f32
    %3 = vector.broadcast %cst_1 : f32 to vector<1x16xf32>
    %4 = arith.divf %2, %3 : vector<1x16xf32>
    %5 = vector.broadcast %4 : vector<1x16xf32> to vector<8x16xf32>
    %6 = arith.subf %0, %5 : vector<8x16xf32>
    %7 = arith.mulf %6, %6 : vector<8x16xf32>
    %cst_2 = arith.constant dense<0.000000e+00> : vector<16xf32>
    %8 = vector.multi_reduction <add>, %7, %cst_2 [0] : vector<8x16xf32> to vector<16xf32>
    %9 = vector.shape_cast %8 : vector<16xf32> to vector<1x16xf32>
    %cst_3 = arith.constant 8.000000e+00 : f32
    %10 = vector.broadcast %cst_3 : f32 to vector<1x16xf32>
    %11 = arith.divf %9, %10 : vector<1x16xf32>
    %cst_4 = arith.constant 9.99999974E-6 : f32
    %12 = vector.broadcast %cst_4 : f32 to vector<1x16xf32>
    %13 = arith.addf %11, %12 : vector<1x16xf32>
    %14 = math.rsqrt %13 : vector<1x16xf32>
    %15 = vector.broadcast %14 : vector<1x16xf32> to vector<8x16xf32>
    %16 = arith.mulf %6, %15 : vector<8x16xf32>
    %c0_5 = arith.constant 0 : index
    %c0_6 = arith.constant 0 : index
    %17 = vector.load %arg4[%c0_5, %c0_6] : memref<8x128xf32, #tpu.memory_space<vmem>>, vector<8x128xf32>
    %18 = vector.extract_strided_slice %17 {offsets = [0, 0], sizes = [1, 32], strides = [1, 1]} : vector<8x128xf32> to vector<1x32xf32>
    %19 = vector.extract_strided_slice %17 {offsets = [1, 0], sizes = [1, 32], strides = [1, 1]} : vector<8x128xf32> to vector<1x32xf32>
    %20 = vector.extract_strided_slice %17 {offsets = [2, 0], sizes = [1, 32], strides = [1, 1]} : vector<8x128xf32> to vector<1x32xf32>
    %21 = arith.truncf %16 : vector<8x16xf32> to vector<8x16xbf16>
    %c0_7 = arith.constant 0 : index
    %c0_8 = arith.constant 0 : index
    %22 = vector.load %arg1[%c0_7, %c0_8] : memref<16x32xbf16, #tpu.memory_space<vmem>>, vector<16x32xbf16>
    %cst_9 = arith.constant dense<0.000000e+00> : vector<8x32xf32>
    %23 = tpu.matmul %21, %22, %cst_9 {dimension_numbers = #tpu.dot_dimension_numbers<[1], [0], [0], [1], [0, 0, 1, 1], [], []>} : vector<8x16xbf16>, vector<16x32xbf16>, vector<8x32xf32> -> vector<8x32xf32>
    %24 = vector.broadcast %18 : vector<1x32xf32> to vector<8x32xf32>
    %25 = arith.addf %23, %24 : vector<8x32xf32>
    %cst_10 = arith.constant dense<0.000000e+00> : vector<8xf32>
    %26 = vector.multi_reduction <add>, %25, %cst_10 [1] : vector<8x32xf32> to vector<8xf32>
    %27 = vector.shape_cast %26 : vector<8xf32> to vector<8x1xf32>
    %cst_11 = arith.constant 3.200000e+01 : f32
    %28 = vector.broadcast %cst_11 : f32 to vector<8x1xf32>
    %29 = arith.divf %27, %28 : vector<8x1xf32>
    %30 = vector.broadcast %29 : vector<8x1xf32> to vector<8x32xf32>
    %31 = arith.subf %25, %30 : vector<8x32xf32>
    %32 = arith.mulf %31, %31 : vector<8x32xf32>
    %cst_12 = arith.constant dense<0.000000e+00> : vector<8xf32>
    %33 = vector.multi_reduction <add>, %32, %cst_12 [1] : vector<8x32xf32> to vector<8xf32>
    %34 = vector.shape_cast %33 : vector<8xf32> to vector<8x1xf32>
    %cst_13 = arith.constant 3.200000e+01 : f32
    %35 = vector.broadcast %cst_13 : f32 to vector<8x1xf32>
    %36 = arith.divf %34, %35 : vector<8x1xf32>
    %cst_14 = arith.constant 9.99999974E-6 : f32
    %37 = vector.broadcast %cst_14 : f32 to vector<8x1xf32>
    %38 = arith.addf %36, %37 : vector<8x1xf32>
    %39 = math.rsqrt %38 : vector<8x1xf32>
    %40 = vector.broadcast %39 : vector<8x1xf32> to vector<8x32xf32>
    %41 = arith.mulf %31, %40 : vector<8x32xf32>
    %42 = vector.broadcast %19 : vector<1x32xf32> to vector<8x32xf32>
    %43 = arith.mulf %41, %42 : vector<8x32xf32>
    %44 = vector.broadcast %20 : vector<1x32xf32> to vector<8x32xf32>
    %45 = arith.addf %43, %44 : vector<8x32xf32>
    %cst_15 = arith.constant 0.000000e+00 : f32
    %46 = vector.broadcast %cst_15 : f32 to vector<8x32xf32>
    %47 = arith.maximumf %45, %46 : vector<8x32xf32>
    %48 = vector.extract_strided_slice %17 {offsets = [3, 0], sizes = [1, 32], strides = [1, 1]} : vector<8x128xf32> to vector<1x32xf32>
    %49 = vector.extract_strided_slice %17 {offsets = [4, 0], sizes = [1, 32], strides = [1, 1]} : vector<8x128xf32> to vector<1x32xf32>
    %50 = vector.extract_strided_slice %17 {offsets = [5, 0], sizes = [1, 32], strides = [1, 1]} : vector<8x128xf32> to vector<1x32xf32>
    %51 = arith.truncf %47 : vector<8x32xf32> to vector<8x32xbf16>
    %c0_16 = arith.constant 0 : index
    %c0_17 = arith.constant 0 : index
    %52 = vector.load %arg2[%c0_16, %c0_17] : memref<32x32xbf16, #tpu.memory_space<vmem>>, vector<32x32xbf16>
    %cst_18 = arith.constant dense<0.000000e+00> : vector<8x32xf32>
    %53 = tpu.matmul %51, %52, %cst_18 {dimension_numbers = #tpu.dot_dimension_numbers<[1], [0], [0], [1], [0, 0, 1, 1], [], []>} : vector<8x32xbf16>, vector<32x32xbf16>, vector<8x32xf32> -> vector<8x32xf32>
    %54 = vector.broadcast %48 : vector<1x32xf32> to vector<8x32xf32>
    %55 = arith.addf %53, %54 : vector<8x32xf32>
    %cst_19 = arith.constant dense<0.000000e+00> : vector<8xf32>
    %56 = vector.multi_reduction <add>, %55, %cst_19 [1] : vector<8x32xf32> to vector<8xf32>
    %57 = vector.shape_cast %56 : vector<8xf32> to vector<8x1xf32>
    %cst_20 = arith.constant 3.200000e+01 : f32
    %58 = vector.broadcast %cst_20 : f32 to vector<8x1xf32>
    %59 = arith.divf %57, %58 : vector<8x1xf32>
    %60 = vector.broadcast %59 : vector<8x1xf32> to vector<8x32xf32>
    %61 = arith.subf %55, %60 : vector<8x32xf32>
    %62 = arith.mulf %61, %61 : vector<8x32xf32>
    %cst_21 = arith.constant dense<0.000000e+00> : vector<8xf32>
    %63 = vector.multi_reduction <add>, %62, %cst_21 [1] : vector<8x32xf32> to vector<8xf32>
    %64 = vector.shape_cast %63 : vector<8xf32> to vector<8x1xf32>
    %cst_22 = arith.constant 3.200000e+01 : f32
    %65 = vector.broadcast %cst_22 : f32 to vector<8x1xf32>
    %66 = arith.divf %64, %65 : vector<8x1xf32>
    %cst_23 = arith.constant 9.99999974E-6 : f32
    %67 = vector.broadcast %cst_23 : f32 to vector<8x1xf32>
    %68 = arith.addf %66, %67 : vector<8x1xf32>
    %69 = math.rsqrt %68 : vector<8x1xf32>
    %70 = vector.broadcast %69 : vector<8x1xf32> to vector<8x32xf32>
    %71 = arith.mulf %61, %70 : vector<8x32xf32>
    %72 = vector.broadcast %49 : vector<1x32xf32> to vector<8x32xf32>
    %73 = arith.mulf %71, %72 : vector<8x32xf32>
    %74 = vector.broadcast %50 : vector<1x32xf32> to vector<8x32xf32>
    %75 = arith.addf %73, %74 : vector<8x32xf32>
    %cst_24 = arith.constant 0.000000e+00 : f32
    %76 = vector.broadcast %cst_24 : f32 to vector<8x32xf32>
    %77 = arith.maximumf %75, %76 : vector<8x32xf32>
    %78 = arith.truncf %77 : vector<8x32xf32> to vector<8x32xbf16>
    %c0_25 = arith.constant 0 : index
    %c0_26 = arith.constant 0 : index
    %79 = vector.load %arg3[%c0_25, %c0_26] : memref<32x128xbf16, #tpu.memory_space<vmem>>, vector<32x128xbf16>
    %cst_27 = arith.constant dense<0.000000e+00> : vector<8x128xf32>
    %80 = tpu.matmul %78, %79, %cst_27 {dimension_numbers = #tpu.dot_dimension_numbers<[1], [0], [0], [1], [0, 0, 1, 1], [], []>} : vector<8x32xbf16>, vector<32x128xbf16>, vector<8x128xf32> -> vector<8x128xf32>
    %81 = vector.extract_strided_slice %17 {offsets = [6, 0], sizes = [1, 128], strides = [1, 1]} : vector<8x128xf32> to vector<1x128xf32>
    %82 = vector.broadcast %81 : vector<1x128xf32> to vector<8x128xf32>
    %83 = arith.addf %80, %82 : vector<8x128xf32>
    %84 = math.tanh %83 : vector<8x128xf32>
    %c0_28 = arith.constant 0 : index
    %c0_29 = arith.constant 0 : index
    %85 = vector.load %arg5[%c0_28, %c0_29] : memref<8x128xf32, #tpu.memory_space<vmem>>, vector<8x128xf32>
    tpu.vector_store %arg5[%c0_28, %c0_29], %84 {strides = array<i32>} : memref<8x128xf32, #tpu.memory_space<vmem>>, vector<8x128xf32>,
    return
  }
}

</mosaic_0001>

<bundles_post_ra>
// kernel: _fc_actor_jit.1
= control target key start
LH: loop header
LB: loop body
LE: loop exit
PB: predicated region body
PF: predicated region fallthrough
CT: control target
= control target key end

     0   :  { %10 = vsyncpa [#allocation3], 0  ;;  %s634_s0 = inlined_call_operand.hbm [shape: f32[8,16], index: 0, kind: input, shape index: {}]   ;;  %s635_s1 = inlined_call_operand.hbm [shape: bf16[16,32], index: 1, kind: input, shape index: {}]   ;;  %s636_s2 = inlined_call_operand.hbm [shape: bf16[32,32], index: 2, kind: input, shape index: {}]   ;;  %s637_s3 = inlined_call_operand.hbm [shape: bf16[32,128], index: 3, kind: input, shape index: {}]   ;;  %s638_s4 = inlined_call_operand.vmem [shape: f32[8,128], index: 4, kind: input, shape index: {}]   ;;  %s639_s5 = inlined_call_operand.vmem [shape: f32[8,128], index: 5, kind: output, shape index: {}]  }
   0x1   :  { %11 = vsyncpa [#allocation5], 0 }
   0x2   :  { %12 = vsyncpa [#allocation8], 0  ;;  %s495_s18 = smov [#allocation4]   ;;  %s401_s22 = scalar_lea.hbm %s635_s1, 128 }
   0x3   :  { %s28_s19 = sshll.u32 %s495_s18, 4  ;;  %p402_p0 = scmp.ne.s32.totalorder %s635_s1, %s401_s22  ;;  %s29_s19 = int_to_ptr.vmem [resolvable:$true] %s28_s19 }
   0x4   :  { %p405_p1 = scmp.lt.u32.totalorder %s401_s22, %s635_s1 }
   0x6   :  { %p407_p2 = pnand %p405_p1, %p402_p0 }
   0x8   :  { %410 = shalt.err (!%p407_p2)
}
   0x9   :  { %s411_s27 = scalar_lea.vmem %s29_s19, 128  ;;  %p416_p4 = scmp.lt.s32.totalorder %s29_s19, %s29_s19 }
   0xa   :  { %p412_p3 = scmp.ne.s32.totalorder %s29_s19, %s411_s27  ;;  %p417_p5 = scmp.lt.s32.totalorder %s411_s27, %s411_s27 }
   0xc   :  { %p418_p6 = por %p417_p5, %p416_p4 }
   0xe   :  { %p419_p7 = pnand %p418_p6, %p412_p3 }
  0x10   :  { %422 = shalt.err (!%p419_p7)
}
  0x11   :  { %s496_s28 = smov 64   ;;  %s497_s29 = smov 4  }
  0x12   :  { %34 = dma.hbm_to_vmem [thread:$0]  %s635_s1, 128, %s29_s19, [#allocation5], %s496_s28, %s496_s28, %s497_s29  }
  0x13   :  { %s498_s7 = smov [#allocation2]   ;;  %s499_s9 = smov [#allocation6]  }
  0x14   :  { %s19_s8 = sshll.u32 %s498_s7, 4  ;;  %s40_s10 = sshll.u32 %s499_s9, 4  ;;  %s20_s8 = int_to_ptr.vmem [resolvable:$true] %s19_s8  ;;  %s41_s10 = int_to_ptr.vmem [resolvable:$true] %s40_s10 }
  0x15   :  { %s423_s13 = scalar_lea.hbm %s634_s0, 128 }
  0x16   :  { %p424_p8 = scmp.ne.s32.totalorder %s634_s0, %s423_s13  ;;  %p427_p9 = scmp.lt.u32.totalorder %s423_s13, %s634_s0 }
  0x18   :  { %p429_p10 = pnand %p427_p9, %p424_p8 }
  0x1a   :  { %432 = shalt.err (!%p429_p10)
}
  0x1b   :  { %s433_s1 = scalar_lea.vmem %s20_s8, 128  ;;  %p438_p12 = scmp.lt.s32.totalorder %s20_s8, %s20_s8 }
  0x1c   :  { %p434_p11 = scmp.ne.s32.totalorder %s20_s8, %s433_s1  ;;  %p439_p13 = scmp.lt.s32.totalorder %s433_s1, %s433_s1 }
  0x1e   :  { %p440_p0 = por %p439_p13, %p438_p12 }
  0x20   :  { %p441_p1 = pnand %p440_p0, %p434_p11 }
  0x22   :  { %444 = shalt.err (!%p441_p1)
}
  0x23   :  { %22 = dma.hbm_to_vmem [thread:$0]  %s634_s0, 128, %s20_s8, [#allocation3]  }
  0x24   :  { %s445_s22 = scalar_lea.hbm %s636_s2, 256 }
  0x25   :  { %p446_p2 = scmp.ne.s32.totalorder %s636_s2, %s445_s22  ;;  %p449_p3 = scmp.lt.u32.totalorder %s445_s22, %s636_s2 }
  0x27   :  { %p451_p4 = pnand %p449_p3, %p446_p2 }
  0x29   :  { %454 = shalt.err (!%p451_p4)
}
  0x2a   :  { %s455_s27 = scalar_lea.vmem %s41_s10, 256  ;;  %p460_p6 = scmp.lt.s32.totalorder %s41_s10, %s41_s10 }
  0x2b   :  { %p456_p5 = scmp.ne.s32.totalorder %s41_s10, %s455_s27  ;;  %p461_p7 = scmp.lt.s32.totalorder %s455_s27, %s455_s27 }
  0x2d   :  { %p462_p8 = por %p461_p7, %p460_p6 }
  0x2f   :  { %p463_p9 = pnand %p462_p8, %p456_p5 }
  0x31   :  { %466 = shalt.err (!%p463_p9)
}
  0x32   :  { %46 = dma.hbm_to_vmem [thread:$0]  %s636_s2, 256, %s41_s10, [#allocation5], %s496_s28, %s496_s28, %s497_s29  }
  0x33   :  { %s500_s6 = smov [#allocation7]   ;;  %s467_s11 = scalar_lea.hbm %s637_s3, 256 }
  0x34   :  { %s52_s7 = sshll.u32 %s500_s6, 4  ;;  %p468_p10 = scmp.ne.s32.totalorder %s637_s3, %s467_s11  ;;  %s53_s7 = int_to_ptr.vmem [resolvable:$true] %s52_s7 }
  0x35   :  { %p471_p11 = scmp.lt.u32.totalorder %s467_s11, %s637_s3 }
  0x37   :  { %p473_p12 = pnand %p471_p11, %p468_p10 }
  0x39   :  { %476 = shalt.err (!%p473_p12)
}
  0x3a   :  { %s477_s16 = scalar_lea.vmem %s53_s7, 256  ;;  %p482_p0 = scmp.lt.s32.totalorder %s53_s7, %s53_s7 }
  0x3b   :  { %p478_p13 = scmp.ne.s32.totalorder %s53_s7, %s477_s16  ;;  %p483_p1 = scmp.lt.s32.totalorder %s477_s16, %s477_s16 }
  0x3d   :  { %p484_p2 = por %p483_p1, %p482_p0 }
  0x3f   :  { %p485_p3 = pnand %p484_p2, %p478_p13 }
  0x41   :  { %488 = shalt.err (!%p485_p3)
}
  0x42   :  { %58 = dma.hbm_to_vmem [thread:$0]  %s637_s3, 256, %s53_s7, [#allocation8], %s496_s28, %s496_s28, %s497_s29  }
  0x43   :  { %489 = dma.done.wait [#allocation3], 128  }
  0x44   :  { %490 = vsyncadd [#allocation3], 4294967168 }
  0x45   :  { %491 = dma.done.wait [#allocation5], 384  }
  0x46   :  { %492 = vsyncadd [#allocation5], 4294966912 }
  0x47   :  { %493 = dma.done.wait [#allocation8], 256  }
  0x48   :  { %494 = vsyncadd [#allocation8], 4294967040  ;;  %v501_v0 = vmov 0.0   ;;  %vm502_vm0 = vmmov 0   ;;  %vm75_vm1 = vcmask 130048   ;;  %v388_v1 = vld [vmem:[#allocation4] sm:$0xff]   ;;  %v102_v25 = vlaneseq }
  0x49   :  { %358 = vmatprep.subr.bf16.mxu0 %v501_v0  ;;  %360 = vmatprep.mubr.msk.bf16.mxu0 %vm502_vm0, %v501_v0  ;;  %v74_v2 = vld [vmem:[#allocation2] sm:$0xff]  ;;  %vm155_vm2 = vcmask 261120   ;;  %v389_v41 = vld [vmem:[#allocation6] sm:$0xff]   ;;  %v390_v42 = vld [vmem:[#allocation6 + $0x8] sm:$0xff]  }
  0x4a   :  { %364 = vmatprep.subr.bf16.mxu1 %v501_v0  ;;  %368 = vmatprep.mubr.msk.bf16.mxu1 %vm502_vm0, %v501_v0  ;;  %v76_v3 = vsel %vm75_vm1, %v74_v2, 0.0  ;;  %v602_v26 = vshrl.u32 %v102_v25, 7  ;;  %v608_v28 = vld [vmem:[%s638_s4] sm:$0xff] }
  0x4b   :  { %359 = vmatpush3.bf16.msra.mxu0 %v388_v1  ;;  %v77_v4 = vrot.slane %v76_v3, 4  ;;  %365 = vmatpush3.bf16.msra.mxu1 %v389_v41 }
  0x4c   :  { %372 = vmatprep.subr.bf16.mxu0 %v501_v0  ;;  %v104_v27 = vsub.s32 0, %v602_v26  ;;  %366 = vmatprep.subr.bf16.mxu1 %v501_v0  ;;  %v172_v46 = vsub.s32 1, %v602_v26  ;;  %v177_v47 = vsub.s32 2, %v602_v26  ;;  %v188_v56 = vsub.s32 3, %v602_v26 }
  0x4d   :  { %v78_v5 = vadd.f32 %v77_v4, %v76_v3 }
  0x4e   :  { %v105_v29 = vrot.slane %v608_v28, %v104_v27  ;;  %v173_v48 = vrot.slane %v608_v28, %v172_v46  ;;  %v178_v51 = vrot.slane %v608_v28, %v177_v47  ;;  %v189_v57 = vrot.slane %v608_v28, %v188_v56 }
  0x4f   :  { %v79_v6 = vrot.slane %v78_v5, 2  ;;  %367 = vmatpush3.bf16.msra.mxu1 %v390_v42 }
  0x51   :  { %v80_v7 = vadd.f32 %v79_v6, %v78_v5  ;;  %v391_v6 = vld [vmem:[#allocation7] sm:$0xff]  }
  0x53   :  { %v81_v8 = vrot.slane %v80_v7, 1 }
  0x55   :  { %v82_v9 = vadd.f32 %v81_v8, %v80_v7  ;;  %v392_v7 = vld [vmem:[#allocation7 + $0x8] sm:$0xff]  }
  0x57   :  { %v84_v10 = vmul.f32 0.125, %v82_v9 }
  0x59   :  { %v85_v11 = vsub.f32 %v74_v2, %v84_v10 }
  0x5b   :  { %v86_v12 = vmul.f32 %v85_v11, %v85_v11 }
  0x5d   :  { %v87_v13 = vsel %vm75_vm1, %v86_v12, 0.0  ;;  %v265_v12 = vsub.s32 5, %v602_v26 }
  0x5e   :  { %v88_v14 = vrot.slane %v87_v13, 4 }
  0x60   :  { %v89_v15 = vadd.f32 %v88_v14, %v87_v13 }
  0x62   :  { %v90_v16 = vrot.slane %v89_v15, 2 }
  0x64   :  { %v91_v17 = vadd.f32 %v90_v16, %v89_v15  ;;  %v266_v16 = vrot.slane %v608_v28, %v265_v12 }
  0x66   :  { %v92_v18 = vrot.slane %v91_v17, 1 }
  0x68   :  { %v93_v19 = vadd.f32 %v92_v18, %v91_v17 }
  0x6a   :  { %v94_v20 = vmul.f32 0.125, %v93_v19 }
  0x6c   :  { %v95_v21 = vadd.f32 1e-05, %v94_v20 }
  0x6e   :  { %393 = vrsqrt.f32 %v95_v21 }
  0x78   :  { %v394_v22 = vpop.eup %393 }
  0x79   :  { %v97_v23 = vmul.f32 %v394_v22, %v85_v11  ;;  %v260_v11 = vsub.s32 4, %v602_v26 }
  0x7b   :  { %v99_v24 = vpack.c.bf16 %v97_v23, %v97_v23  ;;  %v261_v13 = vrot.slane %v608_v28, %v260_v11 }
  0x7d   :  { %361 = vmatmul.mubr.msk.bf16.vlgmr.msra.gmra.mrb[0].mxu0 %vm75_vm1, %v99_v24 }
  0x7e   :  { %376 = vmatprep.mubr.msk.bf16.mxu0 %vm502_vm0, %v501_v0  ;;  %373 = vmatpush3.bf16.msra.mxu0 %v391_v6 }
  0x7f   :  { %374 = vmatprep.subr.bf16.mxu0 %v501_v0  ;;  %v276_v0 = vsub.s32 6, %v602_v26 }
  0x81   :  { %v277_v21 = vrot.slane %v608_v28, %v276_v0 }
  0x82   :  { %375 = vmatpush3.bf16.msra.mxu0 %v392_v7 }
 0x150   :  { %v149_v30 = vpop.f32.mrb[0].mxu0 }
 0x151   :  { %v150_v31 = vadd.f32 %v149_v30, %v105_v29  ;;  %v362_v32 = vpop.f32.mrb[1].mxu0 }
 0x152   :  { %v152_v33 = vpop.f32.mrb[2].mxu0 }
 0x153   :  { %v363_v34 = vpop.f32.mrb[3].mxu0  ;;  %v156_v35 = vsel %vm155_vm2, %v150_v31, 0.0 }
 0x154   :  { %157 = vadd.xlane.f32.xlu0 %v156_v35 }
 0x1e1   :  { %v158_v36 = vpop.xlane.xlu0 %157 }
 0x1e2   :  { %v160_v37 = vmul.f32 0.03125, %v158_v36 }
 0x1e4   :  { %v161_v38 = vsub.f32 %v150_v31, %v160_v37 }
 0x1e6   :  { %v162_v39 = vmul.f32 %v161_v38, %v161_v38 }
 0x1e8   :  { %v163_v40 = vsel %vm155_vm2, %v162_v39, 0.0 }
 0x1e9   :  { %164 = vadd.xlane.f32.xlu0 %v163_v40 }
 0x276   :  { %v165_v43 = vpop.xlane.xlu0 %164 }
 0x277   :  { %v166_v44 = vmul.f32 0.03125, %v165_v43 }
 0x279   :  { %v167_v45 = vadd.f32 1e-05, %v166_v44 }
 0x27b   :  { %395 = vrsqrt.f32 %v167_v45 }
 0x285   :  { %v396_v49 = vpop.eup %395 }
 0x286   :  { %v169_v50 = vmul.f32 %v396_v49, %v161_v38 }
 0x288   :  { %v174_v52 = vmul.f32 %v173_v48, %v169_v50 }
 0x28a   :  { %v179_v53 = vadd.f32 %v178_v51, %v174_v52 }
 0x28c   :  { %v180_v54 = vmax.f32 %v179_v53, 0.0 }
 0x28e   :  { %v181_v55 = vpack.c.bf16 %v180_v54, %v180_v54 }
 0x290   :  { %369 = vmatmul.mubr.msk.bf16.vlgmr.msra.gmra.mrb[0].mxu1 %vm155_vm2, %v181_v55 }
 0x363   :  { %v239_v58 = vpop.f32.mrb[0].mxu1 }
 0x364   :  { %v240_v59 = vadd.f32 %v239_v58, %v189_v57  ;;  %v370_v60 = vpop.f32.mrb[1].mxu1 }
 0x365   :  { %v242_v61 = vpop.f32.mrb[2].mxu1 }
 0x366   :  { %v371_v62 = vpop.f32.mrb[3].mxu1  ;;  %v245_v63 = vsel %vm155_vm2, %v240_v59, 0.0 }
 0x367   :  { %246 = vadd.xlane.f32.xlu1 %v245_v63 }
 0x3f4   :  { %v247_v1 = vpop.xlane.xlu1 %246 }
 0x3f5   :  { %v248_v2 = vmul.f32 0.03125, %v247_v1 }
 0x3f7   :  { %v249_v3 = vsub.f32 %v240_v59, %v248_v2 }
 0x3f9   :  { %v250_v4 = vmul.f32 %v249_v3, %v249_v3 }
 0x3fb   :  { %v251_v5 = vsel %vm155_vm2, %v250_v4, 0.0 }
 0x3fc   :  { %252 = vadd.xlane.f32.xlu1 %v251_v5 }
 0x489   :  { %v253_v8 = vpop.xlane.xlu1 %252 }
 0x48a   :  { %v254_v9 = vmul.f32 0.03125, %v253_v8 }
 0x48c   :  { %v255_v10 = vadd.f32 1e-05, %v254_v9 }
 0x48e   :  { %397 = vrsqrt.f32 %v255_v10 }
 0x498   :  { %v398_v14 = vpop.eup %397 }
 0x499   :  { %v257_v15 = vmul.f32 %v398_v14, %v249_v3 }
 0x49b   :  { %v262_v17 = vmul.f32 %v261_v13, %v257_v15 }
 0x49d   :  { %v267_v18 = vadd.f32 %v266_v16, %v262_v17 }
 0x49f   :  { %v268_v19 = vmax.f32 %v267_v18, 0.0 }
 0x4a1   :  { %v269_v20 = vpack.c.bf16 %v268_v19, %v268_v19 }
 0x4a3   :  { %377 = vmatmul.mubr.msk.bf16.vlgmr.msra.gmra.mrb[4].mxu0 %vm155_vm2, %v269_v20 }
 0x576   :  { %v327_v22 = vpop.f32.mrb[4].mxu0 }
 0x577   :  { %v328_v23 = vadd.f32 %v327_v22, %v277_v21  ;;  %v378_v24 = vpop.f32.mrb[5].mxu0 }
 0x578   :  { %v330_v25 = vpop.f32.mrb[6].mxu0 }
 0x579   :  { %399 = vtanh.f32 %v328_v23  ;;  %v379_v27 = vpop.f32.mrb[7].mxu0 }
 0x583   :  { %v400_v29 = vpop.eup %399 }
 0x584   :  { %334 = vst [vmem:[%s639_s5] sm:$0xff] %v400_v29 }
 0x585   :  { %339 = vsyncpa [#allocation3], 1 }
 0x586   :  { %340 = vsyncpa [#allocation5], 1 }
 0x587   :  { %341 = vsyncpa [#allocation8], 1 }

</bundles_post_ra>
